<compile_context>
chip_gen: v6e
topology: v6e:2x2x1
jax: 0.10.0
libtpu: 0.0.40
codegen_flags: <defaults>
</compile_context>

<pallas_src>
import functools

import jax
import jax.numpy as jnp
from jax.experimental import pallas as pl
from jax.experimental.pallas import tpu as pltpu


def _round_up(x, m):
    return ((x + m - 1) // m) * m


def _ce2d_kernel(tgt_ref, *refs, ignore_label, hw, tile_hw):
    """refs = (pred_ref_0 ... pred_ref_{P-1}, out_ref)."""
    pred_refs = refs[:-1]
    out_ref = refs[-1]

    C = pred_refs[0].shape[1]            # pred block is (1, C, tile_hw)
    tgt = tgt_ref[0]                     # (1, tile_hw) int32

    # Valid-pixel mask: not the ignore label and (ragged last tile only) inside
    # the real pixel range.
    valid = tgt != ignore_label          # (1, tile_hw) bool
    if hw % tile_hw != 0:
        lane = jax.lax.broadcasted_iota(jnp.int32, (1, tile_hw), 1)
        pix = pl.program_id(1) * tile_hw + lane
        valid = jnp.logical_and(valid, pix < hw)

    # Boolean selector of the target class, shared by all preds (no f32 onehot).
    cls = jax.lax.broadcasted_iota(jnp.int32, (C, tile_hw), 0)
    sel = cls == tgt                     # (C, tile_hw) bool

    nll_total = jnp.zeros((1, tile_hw), jnp.float32)
    for pref in pred_refs:
        x = pref[0]                                              # (C, tile_hw) native dtype
        m = jnp.max(x, axis=0, keepdims=True).astype(jnp.float32)
        e = jnp.exp(x.astype(jnp.float32) - m)                   # upcast fused into sub/exp
        lse = jnp.log(jnp.sum(e, axis=0, keepdims=True))
        picked = jnp.sum(jnp.where(sel, x, 0.0).astype(jnp.float32),
                         axis=0, keepdims=True)
        # -log_softmax(x)[target] = m + lse - x[target]
        nll_total = nll_total + (m + lse - picked)

    # True select (NOT multiply): edge-padded lanes may hold Inf/NaN and must
    # never propagate.
    masked = jnp.where(valid, nll_total, 0.0)
    s = jnp.sum(masked)                                          # partial NLL sum
    cnt = jnp.sum(valid.astype(jnp.float32))                     # partial valid count

    # Single unmasked store: sublane 0 broadcasts s, sublane 1 broadcasts cnt.
    row = jax.lax.broadcasted_iota(jnp.int32, (1, 1, 2, 128), 2)
    out_ref[...] = jnp.where(row == 0, s, cnt).astype(jnp.float32)


def cross_entropy_loss_2d(preds, target, *, ignore_label=255, loss_p=1.0,
                          tile_hw=16384):
    """preds: sequence of arrays (N, C, H, W); target: (N, H, W) int."""
    preds = tuple(preds)
    n_preds = len(preds)
    N, C, H, W = preds[0].shape
    HW = H * W

    # Free reshapes only: no transpose, no stack, no dtype cast, no padding.
    preds3 = [p.reshape(N, C, HW) for p in preds]
    tgt3 = target.reshape(N, 1, HW).astype(jnp.int32)

    # --- Pixel-tile derivation: HBM-bound kernel, so bigger is better, capped
    # so double-buffered pred blocks + f32 temporaries fit under the 32 MiB
    # scoped VMEM limit (safe on v5e/v6e/v7x alike).
    in_bytes = jnp.dtype(preds3[0].dtype).itemsize
    budget = 24 * 1024 * 1024
    per_pixel = (n_preds * 2 * C * in_bytes      # double-buffered pred tiles
                 + 2 * 4                         # double-buffered int32 target tile
                 + 4 * C * 4)                    # in-kernel f32 (C, tile) temporaries
    cap = max(128, (budget // per_pixel) // 128 * 128)
    tile = min(int(tile_hw), cap, _round_up(HW, 128))
    tile = max(128, (tile // 128) * 128)
    if tile > HW:
        tile = HW                                # single block == full array dim
    ntiles = pl.cdiv(HW, tile)

    kernel = functools.partial(_ce2d_kernel, ignore_label=ignore_label,
                               hw=HW, tile_hw=tile)

    # TODO(synk): if an xprof trace on v5e shows exposed DMA at this tile size,
    # add pipeline_mode=pl.Buffered(3) to pred_spec (VMEM is abundant there).
    pred_spec = pl.BlockSpec((1, C, tile), lambda n, t: (n, 0, t))
    tgt_spec = pl.BlockSpec((1, 1, tile), lambda n, t: (n, 0, t))
    out_spec = pl.BlockSpec((1, 1, 2, 128), lambda n, t: (n, t, 0, 0))

    partials = pl.pallas_call(
        kernel,
        out_shape=jax.ShapeDtypeStruct((N, ntiles, 2, 128), jnp.float32),
        grid_spec=pltpu.PrefetchScalarGridSpec(
            num_scalar_prefetch=0,
            grid=(N, ntiles),
            in_specs=[tgt_spec] + [pred_spec] * n_preds,
            out_specs=out_spec,
        ),
        compiler_params=pltpu.CompilerParams(
            dimension_semantics=("parallel", "parallel"),
            vmem_limit_bytes=32 * 1024 * 1024),
    )(tgt3, *preds3)

    # Each step broadcast its two scalars across 128 lanes; undo that exactly.
    total_nll = jnp.sum(partials[:, :, 0, :]) * (1.0 / 128.0)
    n_valid = jnp.sum(partials[:, :, 1, :]) * (1.0 / 128.0)

    # Mean over valid pixels (NLLLoss reduction='mean', weight=None); the four
    # per-pred means share the same denominator.  n_valid == 0 yields NaN, which
    # matches PyTorch behaviour.
    # TODO(synk): the PyTorch forward also does `print(self.loss_p)` (a host
    # side-effect); intentionally omitted.
    return jnp.float32(loss_p) * total_nll / n_valid


def _reference_loss(preds, target, *, ignore_label=255, loss_p=1.0):
    """Pure-JAX reference of the PyTorch forward."""
    total = jnp.float32(0.0)
    tgt = target.astype(jnp.int32)
    valid = tgt != ignore_label
    safe_tgt = jnp.where(valid, tgt, 0)
    n_valid = jnp.sum(valid.astype(jnp.float32))
    for pr in preds:
        logp = jax.nn.log_softmax(pr.astype(jnp.float32), axis=1)  # (N,C,H,W)
        picked = jnp.take_along_axis(logp, safe_tgt[:, None, :, :], axis=1)[:, 0]
        nll = jnp.where(valid, -picked, 0.0)
        total = total + jnp.sum(nll) / n_valid
    return jnp.float32(loss_p) * total


if __name__ == "__main__":
    key = jax.random.PRNGKey(0)
    N, C, H, W = 2, 4, 16, 16
    ignore_label = 255
    loss_p = 1.0   # nn default in __init__

    k1, k2, k3, k4, kt, km = jax.random.split(key, 6)
    pred1 = jax.random.normal(k1, (N, C, H, W), dtype=jnp.float32)
    pred2 = jax.random.normal(k2, (N, C, H, W), dtype=jnp.float32)
    pred3 = jax.random.normal(k3, (N, C, H, W), dtype=jnp.float32)
    pred4 = jax.random.normal(k4, (N, C, H, W), dtype=jnp.float32)
    target = jax.random.randint(kt, (N, H, W), 0, C, dtype=jnp.int32)
    # Sprinkle in some ignored pixels to exercise ignore_index=255.
    ignore_mask = jax.random.bernoulli(km, 0.1, (N, H, W))
    target = jnp.where(ignore_mask, jnp.int32(ignore_label), target)

    preds = (pred1, pred2, pred3, pred4)

    out = cross_entropy_loss_2d(preds, target,
                                ignore_label=ignore_label, loss_p=loss_p)
    out = jax.block_until_ready(out)

    ref = jax.block_until_ready(
        _reference_loss(preds, target, ignore_label=ignore_label,
                        loss_p=loss_p))

    assert jnp.isfinite(out), "kernel produced non-finite loss"
    assert abs(float(out) - float(ref)) < 1e-4, (float(out), float(ref))
    print("KERNEL_OK")
</pallas_src>

<mosaic_0001>
module attributes {stable_mosaic.version = 11 : i64} {
  func.func @_ce2d_kernel(%arg0: i32, %arg1: i32, %arg2: memref<1x1x256xi32, #tpu.memory_space<vmem>>, %arg3: memref<1x4x256xf32, #tpu.memory_space<vmem>>, %arg4: memref<1x4x256xf32, #tpu.memory_space<vmem>>, %arg5: memref<1x4x256xf32, #tpu.memory_space<vmem>>, %arg6: memref<1x4x256xf32, #tpu.memory_space<vmem>>, %arg7: memref<1x1x2x128xf32, #tpu.memory_space<vmem>>) attributes {dimension_semantics = [#tpu.dimension_semantics<parallel>, #tpu.dimension_semantics<parallel>], iteration_bounds = array<i64: 2, 1>, scalar_prefetch = 0 : i64, scratch_operands = 0 : i64, tpu.core_type = #tpu.core_type<tc>, window_params = [{transform_indices = @transform_0, window_bounds = array<i64: 1, 1, 256>}, {transform_indices = @transform_1, window_bounds = array<i64: 1, 4, 256>}, {transform_indices = @transform_2, window_bounds = array<i64: 1, 4, 256>}, {transform_indices = @transform_3, window_bounds = array<i64: 1, 4, 256>}, {transform_indices = @transform_4, window_bounds = array<i64: 1, 4, 256>}, {transform_indices = @transform_5, window_bounds = array<i64: 1, 1, 2, 128>}]} {
    %c0 = arith.constant 0 : index
    %c0_0 = arith.constant 0 : index
    %c0_1 = arith.constant 0 : index
    %0 = vector.load %arg2[%c0, %c0_0, %c0_1] : memref<1x1x256xi32, #tpu.memory_space<vmem>>, vector<1x1x256xi32>
    %1 = vector.shape_cast %0 : vector<1x1x256xi32> to vector<1x256xi32>
    %c255_i32 = arith.constant 255 : i32
    %2 = vector.broadcast %c255_i32 : i32 to vector<1x256xi32>
    %3 = arith.cmpi ne, %1, %2 : vector<1x256xi32>
    %4 = tpu.iota {dimensions = array<i32: 0>} : vector<4x256xi32>
    %5 = vector.broadcast %1 : vector<1x256xi32> to vector<4x256xi32>
    %6 = arith.cmpi eq, %4, %5 : vector<4x256xi32>
    %cst = arith.constant 0.000000e+00 : f32
    %7 = vector.broadcast %cst : f32 to vector<1x256xf32>
    %c0_2 = arith.constant 0 : index
    %c0_3 = arith.constant 0 : index
    %c0_4 = arith.constant 0 : index
    %8 = vector.load %arg3[%c0_2, %c0_3, %c0_4] : memref<1x4x256xf32, #tpu.memory_space<vmem>>, vector<1x4x256xf32>
    %9 = vector.shape_cast %8 : vector<1x4x256xf32> to vector<4x256xf32>
    %cst_5 = arith.constant dense<0xFF800000> : vector<256xf32>
    %10 = vector.multi_reduction <maximumf>, %9, %cst_5 [0] : vector<4x256xf32> to vector<256xf32>
    %11 = vector.shape_cast %10 : vector<256xf32> to vector<1x256xf32>
    %12 = vector.broadcast %11 : vector<1x256xf32> to vector<4x256xf32>
    %13 = arith.subf %9, %12 : vector<4x256xf32>
    %14 = math.exp %13 : vector<4x256xf32>
    %cst_6 = arith.constant dense<0.000000e+00> : vector<256xf32>
    %15 = vector.multi_reduction <add>, %14, %cst_6 [0] : vector<4x256xf32> to vector<256xf32>
    %16 = vector.shape_cast %15 : vector<256xf32> to vector<1x256xf32>
    %17 = math.log %16 : vector<1x256xf32>
    %cst_7 = arith.constant 0.000000e+00 : f32
    %18 = vector.broadcast %cst_7 : f32 to vector<4x256xf32>
    %19 = arith.select %6, %9, %18 : vector<4x256xi1>, vector<4x256xf32>
    %cst_8 = arith.constant dense<0.000000e+00> : vector<256xf32>
    %20 = vector.multi_reduction <add>, %19, %cst_8 [0] : vector<4x256xf32> to vector<256xf32>
    %21 = vector.shape_cast %20 : vector<256xf32> to vector<1x256xf32>
    %22 = arith.addf %11, %17 : vector<1x256xf32>
    %23 = arith.subf %22, %21 : vector<1x256xf32>
    %24 = arith.addf %7, %23 : vector<1x256xf32>
    %c0_9 = arith.constant 0 : index
    %c0_10 = arith.constant 0 : index
    %c0_11 = arith.constant 0 : index
    %25 = vector.load %arg4[%c0_9, %c0_10, %c0_11] : memref<1x4x256xf32, #tpu.memory_space<vmem>>, vector<1x4x256xf32>
    %26 = vector.shape_cast %25 : vector<1x4x256xf32> to vector<4x256xf32>
    %cst_12 = arith.constant dense<0xFF800000> : vector<256xf32>
    %27 = vector.multi_reduction <maximumf>, %26, %cst_12 [0] : vector<4x256xf32> to vector<256xf32>
    %28 = vector.shape_cast %27 : vector<256xf32> to vector<1x256xf32>
    %29 = vector.broadcast %28 : vector<1x256xf32> to vector<4x256xf32>
    %30 = arith.subf %26, %29 : vector<4x256xf32>
    %31 = math.exp %30 : vector<4x256xf32>
    %cst_13 = arith.constant dense<0.000000e+00> : vector<256xf32>
    %32 = vector.multi_reduction <add>, %31, %cst_13 [0] : vector<4x256xf32> to vector<256xf32>
    %33 = vector.shape_cast %32 : vector<256xf32> to vector<1x256xf32>
    %34 = math.log %33 : vector<1x256xf32>
    %cst_14 = arith.constant 0.000000e+00 : f32
    %35 = vector.broadcast %cst_14 : f32 to vector<4x256xf32>
    %36 = arith.select %6, %26, %35 : vector<4x256xi1>, vector<4x256xf32>
    %cst_15 = arith.constant dense<0.000000e+00> : vector<256xf32>
    %37 = vector.multi_reduction <add>, %36, %cst_15 [0] : vector<4x256xf32> to vector<256xf32>
    %38 = vector.shape_cast %37 : vector<256xf32> to vector<1x256xf32>
    %39 = arith.addf %28, %34 : vector<1x256xf32>
    %40 = arith.subf %39, %38 : vector<1x256xf32>
    %41 = arith.addf %24, %40 : vector<1x256xf32>
    %c0_16 = arith.constant 0 : index
    %c0_17 = arith.constant 0 : index
    %c0_18 = arith.constant 0 : index
    %42 = vector.load %arg5[%c0_16, %c0_17, %c0_18] : memref<1x4x256xf32, #tpu.memory_space<vmem>>, vector<1x4x256xf32>
    %43 = vector.shape_cast %42 : vector<1x4x256xf32> to vector<4x256xf32>
    %cst_19 = arith.constant dense<0xFF800000> : vector<256xf32>
    %44 = vector.multi_reduction <maximumf>, %43, %cst_19 [0] : vector<4x256xf32> to vector<256xf32>
    %45 = vector.shape_cast %44 : vector<256xf32> to vector<1x256xf32>
    %46 = vector.broadcast %45 : vector<1x256xf32> to vector<4x256xf32>
    %47 = arith.subf %43, %46 : vector<4x256xf32>
    %48 = math.exp %47 : vector<4x256xf32>
    %cst_20 = arith.constant dense<0.000000e+00> : vector<256xf32>
    %49 = vector.multi_reduction <add>, %48, %cst_20 [0] : vector<4x256xf32> to vector<256xf32>
    %50 = vector.shape_cast %49 : vector<256xf32> to vector<1x256xf32>
    %51 = math.log %50 : vector<1x256xf32>
    %cst_21 = arith.constant 0.000000e+00 : f32
    %52 = vector.broadcast %cst_21 : f32 to vector<4x256xf32>
    %53 = arith.select %6, %43, %52 : vector<4x256xi1>, vector<4x256xf32>
    %cst_22 = arith.constant dense<0.000000e+00> : vector<256xf32>
    %54 = vector.multi_reduction <add>, %53, %cst_22 [0] : vector<4x256xf32> to vector<256xf32>
    %55 = vector.shape_cast %54 : vector<256xf32> to vector<1x256xf32>
    %56 = arith.addf %45, %51 : vector<1x256xf32>
    %57 = arith.subf %56, %55 : vector<1x256xf32>
    %58 = arith.addf %41, %57 : vector<1x256xf32>
    %c0_23 = arith.constant 0 : index
    %c0_24 = arith.constant 0 : index
    %c0_25 = arith.constant 0 : index
    %59 = vector.load %arg6[%c0_23, %c0_24, %c0_25] : memref<1x4x256xf32, #tpu.memory_space<vmem>>, vector<1x4x256xf32>
    %60 = vector.shape_cast %59 : vector<1x4x256xf32> to vector<4x256xf32>
    %cst_26 = arith.constant dense<0xFF800000> : vector<256xf32>
    %61 = vector.multi_reduction <maximumf>, %60, %cst_26 [0] : vector<4x256xf32> to vector<256xf32>
    %62 = vector.shape_cast %61 : vector<256xf32> to vector<1x256xf32>
    %63 = vector.broadcast %62 : vector<1x256xf32> to vector<4x256xf32>
    %64 = arith.subf %60, %63 : vector<4x256xf32>
    %65 = math.exp %64 : vector<4x256xf32>
    %cst_27 = arith.constant dense<0.000000e+00> : vector<256xf32>
    %66 = vector.multi_reduction <add>, %65, %cst_27 [0] : vector<4x256xf32> to vector<256xf32>
    %67 = vector.shape_cast %66 : vector<256xf32> to vector<1x256xf32>
    %68 = math.log %67 : vector<1x256xf32>
    %cst_28 = arith.constant 0.000000e+00 : f32
    %69 = vector.broadcast %cst_28 : f32 to vector<4x256xf32>
    %70 = arith.select %6, %60, %69 : vector<4x256xi1>, vector<4x256xf32>
    %cst_29 = arith.constant dense<0.000000e+00> : vector<256xf32>
    %71 = vector.multi_reduction <add>, %70, %cst_29 [0] : vector<4x256xf32> to vector<256xf32>
    %72 = vector.shape_cast %71 : vector<256xf32> to vector<1x256xf32>
    %73 = arith.addf %62, %68 : vector<1x256xf32>
    %74 = arith.subf %73, %72 : vector<1x256xf32>
    %75 = arith.addf %58, %74 : vector<1x256xf32>
    %cst_30 = arith.constant 0.000000e+00 : f32
    %76 = vector.broadcast %cst_30 : f32 to vector<1x256xf32>
    %77 = arith.select %3, %75, %76 : vector<1x256xi1>, vector<1x256xf32>
    %78 = vector.shape_cast %77 : vector<1x256xf32> to vector<1x1x256xf32>
    %cst_31 = arith.constant dense<0.000000e+00> : vector<1xf32>
    %79 = vector.multi_reduction <add>, %78, %cst_31 [1, 2] : vector<1x1x256xf32> to vector<1xf32>
    %80 = vector.shape_cast %79 : vector<1xf32> to vector<1x1x1xf32>
    %81 = vector.extract %80[0, 0, 0] : f32 from vector<1x1x1xf32>
    %82 = arith.extui %3 : vector<1x256xi1> to vector<1x256xi32>
    %83 = arith.sitofp %82 : vector<1x256xi32> to vector<1x256xf32>
    %84 = vector.shape_cast %83 : vector<1x256xf32> to vector<1x1x256xf32>
    %cst_32 = arith.constant dense<0.000000e+00> : vector<1xf32>
    %85 = vector.multi_reduction <add>, %84, %cst_32 [1, 2] : vector<1x1x256xf32> to vector<1xf32>
    %86 = vector.shape_cast %85 : vector<1xf32> to vector<1x1x1xf32>
    %87 = vector.extract %86[0, 0, 0] : f32 from vector<1x1x1xf32>
    %88 = tpu.iota {dimensions = array<i32: 2>} : vector<1x1x2x128xi32>
    %c0_i32 = arith.constant 0 : i32
    %89 = vector.broadcast %c0_i32 : i32 to vector<1x1x2x128xi32>
    %90 = arith.cmpi eq, %88, %89 : vector<1x1x2x128xi32>
    %91 = vector.broadcast %81 : f32 to vector<1x1x2x128xf32>
    %92 = vector.broadcast %87 : f32 to vector<1x1x2x128xf32>
    %93 = arith.select %90, %91, %92 : vector<1x1x2x128xi1>, vector<1x1x2x128xf32>
    %c0_33 = arith.constant 0 : index
    %c0_34 = arith.constant 0 : index
    %c0_35 = arith.constant 0 : index
    %c0_36 = arith.constant 0 : index
    %94 = vector.load %arg7[%c0_33, %c0_34, %c0_35, %c0_36] : memref<1x1x2x128xf32, #tpu.memory_space<vmem>>, vector<1x1x2x128xf32>
    tpu.vector_store %arg7[%c0_33, %c0_34, %c0_35, %c0_36], %93 {strides = array<i32>} : memref<1x1x2x128xf32, #tpu.memory_space<vmem>>, vector<1x1x2x128xf32>,
    return
  }
  func.func @transform_0(%arg0: i32, %arg1: i32) -> (i32, i32, i32) {
    %c0_i32 = arith.constant 0 : i32
    %c0_i32_0 = arith.constant 0 : i32
    return %arg0, %c0_i32, %arg1 : i32, i32, i32
  }
  func.func @transform_1(%arg0: i32, %arg1: i32) -> (i32, i32, i32) {
    %c0_i32 = arith.constant 0 : i32
    %c0_i32_0 = arith.constant 0 : i32
    return %arg0, %c0_i32, %arg1 : i32, i32, i32
  }
  func.func @transform_2(%arg0: i32, %arg1: i32) -> (i32, i32, i32) {
    %c0_i32 = arith.constant 0 : i32
    %c0_i32_0 = arith.constant 0 : i32
    return %arg0, %c0_i32, %arg1 : i32, i32, i32
  }
  func.func @transform_3(%arg0: i32, %arg1: i32) -> (i32, i32, i32) {
    %c0_i32 = arith.constant 0 : i32
    %c0_i32_0 = arith.constant 0 : i32
    return %arg0, %c0_i32, %arg1 : i32, i32, i32
  }
  func.func @transform_4(%arg0: i32, %arg1: i32) -> (i32, i32, i32) {
    %c0_i32 = arith.constant 0 : i32
    %c0_i32_0 = arith.constant 0 : i32
    return %arg0, %c0_i32, %arg1 : i32, i32, i32
  }
  func.func @transform_5(%arg0: i32, %arg1: i32) -> (i32, i32, i32, i32) {
    %c0_i32 = arith.constant 0 : i32
    %c0_i32_0 = arith.constant 0 : i32
    %c0_i32_1 = arith.constant 0 : i32
    return %arg0, %arg1, %c0_i32, %c0_i32_0 : i32, i32, i32, i32
  }
}

</mosaic_0001>

<bundles_post_ra>
// kernel: tpu_custom_call.1
= control target key start
LH: loop header
LB: loop body
LE: loop exit
PB: predicated region body
PF: predicated region fallthrough
CT: control target
= control target key end

     0   :  { %s1786_s0 = inlined_call_operand.hbm [shape: s32[2,1,256], index: 0, kind: input, shape index: {}]   ;;  %s1787_s1 = inlined_call_operand.hbm [shape: f32[2,4,256], index: 1, kind: input, shape index: {}]   ;;  %s1788_s2 = inlined_call_operand.hbm [shape: f32[2,4,256], index: 2, kind: input, shape index: {}]   ;;  %s1789_s3 = inlined_call_operand.hbm [shape: f32[2,4,256], index: 3, kind: input, shape index: {}]   ;;  %s1790_s4 = inlined_call_operand.hbm [shape: f32[2,4,256], index: 4, kind: input, shape index: {}]   ;;  %s1791_s5 = inlined_call_operand.hbm [shape: f32[2,1,2,128], index: 5, kind: output, shape index: {}]  }
   0x1   :  { %1800 = sst [smem:[#allocation22_spill]] %s1787_s1 }
   0x2   :  { %1801 = sst [smem:[#allocation23_spill]] %s1789_s3 }
   0x3   :  { %1802 = sst [smem:[#allocation24_spill]] %s1791_s5 }
   0x4   :  { %10 = vsyncpa [#allocation3], 0 }
   0x5   :  { %12 = vsyncpa [#allocation3 + $0x1], 0 }
   0x6   :  { %13 = vsyncpa [#allocation6], 0 }
   0x7   :  { %15 = vsyncpa [#allocation6 + $0x1], 0 }
   0x8   :  { %16 = vsyncpa [#allocation9], 0 }
   0x9   :  { %18 = vsyncpa [#allocation9 + $0x1], 0 }
   0xa   :  { %19 = vsyncpa [#allocation4], 0 }
   0xb   :  { %21 = vsyncpa [#allocation4 + $0x1], 0  ;;  %s1401_s18 = smov 0   ;;  %s1403_s19 = smov 0  }
   0xc   :  { %s1405_s20 = smov 0   ;;  %s1407_s21 = smov 0  }
   0xd   :  { %s1409_s22 = smov 0   ;;  %s1411_s23 = smov 0  }
   0xe LB: > { %1803 = sst [smem:[#allocation16_spill]] %s1341_s18  ;;  %s1432_s24 = sadd.s32 4294967295, %s1361_s23   ;;  %s1361_s23 = sphi %s1411_s23, %s27_s23   ;;  %s1357_s22 = sphi %s1409_s22, %s1835_s22   ;;  %s1353_s21 = sphi %s1407_s21, %s1834_s21   ;;  %s1349_s20 = sphi %s1405_s20, %s1830_s20   ;;  %s1345_s19 = sphi %s1403_s19, %s1833_s19   ;;  %s1341_s18 = sphi %s1401_s18, %s1832_s18  }
   0xf   : > { %1804 = sst [smem:[#allocation17_spill]] %s1349_s20  ;;  %s982_s25 = sadd.s32 4294967294, %s1361_s23  }
  0x10   : > { %1805 = sst [smem:[#allocation18_spill]] %s1361_s23  ;;  %s39_s26 = sadd.s32 1, %s1357_s22 }
  0x11   : > { %s48_s27 = sadd.s32 1, %s1349_s20  ;;  %p41_p0 = scmp.ge.s32.totalorder %s39_s26, 2 }
  0x12   : > { %p55_p1 = scmp.ne.s32.totalorder %s1349_s20, %s1345_s19  ;;  %p56_p2 = scmp.eq.s32.totalorder %s1361_s23, 0 }
  0x13   : > { %p61_p3 = scmp.ne.s32.totalorder %s1345_s19, %s1341_s18  ;;  %s1837_s26 = smov (%p41_p0, %s39_s26), 0 }
  0x14   : > { %1806 = sst [smem:[#allocation19_spill]] %s1837_s26  ;;  %p1444_p4 = por %p56_p2, %p55_p1 }
  0x15   : > { %p62_p5 = scmp.eq.s32.totalorder %s1432_s24, 0  ;;  %s43_s29 = ssub.s32 %s1357_s22, %s1837_s26 }
  0x16   : > { %p199_p6 = scmp.eq.s32.totalorder %s1432_s24, 1  ;;  %p46_p7 = scmp.eq.s32.totalorder %s43_s29, 0 }
  0x17   : > { %p1452_p8 = por %p62_p5, %p61_p3  ;;  %p205_p10 = scmp.eq.s32.totalorder %s982_s25, 1 }
  0x18   : > { %p1456_p9 = por %p199_p6, %p55_p1  ;;  %p1053_p13 = scmp.lt.s32.totalorder %s1361_s23, 2 }
  0x19   : > { %s1461_s7 = scalar_select %p46_p7, %s1349_s20, %s48_s27  }
  0x1a   : > { %p1463_p11 = por %p205_p10, %p61_p3  ;;  %s1470_s9 = sand.u32 1, %s1349_s20  }
  0x1b   : > { %1810 = sst [smem:[#allocation20_spill]] %s1461_s7  ;;  %s1792_s10 = sand.u32 1, %s1361_s23  }
  0x1c   : > { %s1811_s8 = scalar_select %p1463_p11, 1, 0 }
  0x1d   : > { %s1474_s11 = sshll.u32 %s1470_s9, 3  ;;  %p1478_p0 = pnand %p1053_p13, %p1444_p4 }
  0x1e   : > { %1812 = sst [smem:[#allocation21_spill]] %s1811_s8  ;;  %s1483_s13 = sshll.u32 %s1357_s22, 7 }
  0x1f   : > { %s1814_s1 = sld [smem:[#allocation22_spill]]  ;;  %s250_s17 = scalar_lea.vmem [#allocation5], %s1474_s11 }
  0x20   : > { %s260_s25 = sshll.u32 %s250_s17, 4  ;;  %p1000_p1 = scmp.ge.s32.totalorder %s1361_s23, 1  ;;  %s261_s25 = int_to_ptr.vmem [resolvable:$true] %s260_s25 }
  0x21   : > { %p328_p2 = scmp.lt.s32.totalorder %s1361_s23, 3  ;;  %s1494_s27 = scalar_lea.sflag [#allocation6], %s1792_s10 }
  0x22   : > { %p1498_p3 = pneg %p1478_p0  ;;  %s1146_s29 = scalar_lea.vmem %s261_s25, 128 }
  0x23   : > { %p1147_p4 = scmp.ne.s32.totalorder %s261_s25, %s1146_s29  ;;  %s1363_s14 = smov [#allocation5]  }
  0x24   : > { %s1151_s15 = sshll.u32 %s1363_s14, 4  ;;  %s1152_s15 = int_to_ptr.vmem [resolvable:$false] %s1151_s15 }
  0x25   : > { %s258_s16 = scalar_lea.hbm %s1814_s1, %s1483_s13  ;;  %p1149_p5 = pnand %p1147_p4, %p1498_p3 }
  0x26   : > { %s1153_s17 = scalar_lea.vmem %s1152_s15, 256  ;;  %p1154_p7 = scmp.lt.s32.totalorder %s261_s25, %s1152_s15 }
  0x27   : > { %p1150_p6 = pneg %p1149_p5  ;;  %p1155_p10 = scmp.lt.s32.totalorder %s1153_s17, %s1146_s29 }
  0x29   : > { %p1156_p13 = por %p1155_p10, %p1154_p7 }
  0x2b   : > { %p1157_p12 = pnand %p1156_p13, %p1150_p6 }
  0x2d   : > { %1160 = shalt.err (!%p1157_p12)
}
  0x2e   : > { %1039 = dma.hbm_to_vmem [thread:$0]  (!%p1478_p0), %s258_s16, 128, %s261_s25, %s1494_s27  }
  0x2f   : > { %p1511_p4 = pnand %p1000_p1, %p328_p2  ;;  %s1817_s3 = sld [smem:[#allocation23_spill]] }
  0x30   : > { %s292_s10 = scalar_lea.vmem [#allocation8], %s1474_s11  ;;  %s1818_s26 = sand.u32 1, %s1361_s23  }
  0x31   : > { %s302_s1 = sshll.u32 %s292_s10, 4  ;;  %s1522_s7 = scalar_lea.sflag [#allocation9], %s1818_s26  ;;  %s303_s1 = int_to_ptr.vmem [resolvable:$true] %s302_s1 }
  0x32   : > { %s1174_s20 = scalar_lea.vmem %s303_s1, 128  ;;  %s1364_s16 = smov [#allocation8]  }
  0x33   : > { %p1175_p12 = scmp.ne.s32.totalorder %s303_s1, %s1174_s20  ;;  %s1179_s25 = sshll.u32 %s1364_s16, 4  ;;  %s1180_s25 = int_to_ptr.vmem [resolvable:$false] %s1179_s25 }
  0x34   : > { %s1181_s8 = scalar_lea.vmem %s1180_s25, 256  ;;  %p1182_p1 = scmp.lt.s32.totalorder %s303_s1, %s1180_s25 }
  0x35   : > { %s300_s17 = scalar_lea.hbm %s1817_s3, %s1483_s13  ;;  %p1177_p5 = pnand %p1175_p12, %p1498_p3 }
  0x36   : > { %p1183_p2 = scmp.lt.s32.totalorder %s1181_s8, %s1174_s20 }
  0x37   : > { %p1178_p6 = pneg %p1177_p5 }
  0x38   : > { %p1184_p7 = por %p1183_p2, %p1182_p1 }
  0x3a   : > { %p1185_p10 = pnand %p1184_p7, %p1178_p6 }
  0x3c   : > { %1188 = shalt.err (!%p1185_p10)
}
  0x3d   : > { %1045 = dma.hbm_to_vmem [thread:$0]  (!%p1478_p0), %s300_s17, 128, %s303_s1, %s1522_s7  }
  0x3e   : > { %s985_s26 = sshll.u32 %s1470_s9, 1  ;;  %s1012_s10 = sshll.u32 %s1357_s22, 5 }
  0x3f   : > { %s237_s16 = scalar_lea.hbm %s1786_s0, %s1012_s10  ;;  %s229_s3 = scalar_lea.vmem [#allocation2], %s985_s26 }
  0x40   : > { %s239_s25 = sshll.u32 %s229_s3, 4  ;;  %s226_s20 = scalar_lea.sflag [#allocation3], %s1470_s9  ;;  %s240_s25 = int_to_ptr.vmem [resolvable:$true] %s239_s25 }
  0x41   : > { %s1202_s8 = scalar_lea.vmem %s240_s25, 32  ;;  %s1365_s23 = smov [#allocation2]  }
  0x42   : > { %p1203_p13 = scmp.ne.s32.totalorder %s240_s25, %s1202_s8  ;;  %s1207_s18 = sshll.u32 %s1365_s23, 4  ;;  %s1208_s18 = int_to_ptr.vmem [resolvable:$false] %s1207_s18 }
  0x43   : > { %s1209_s5 = scalar_lea.vmem %s1208_s18, 64  ;;  %p1210_p6 = scmp.lt.s32.totalorder %s240_s25, %s1208_s18 }
  0x44   : > { %p1205_p12 = pnand %p1203_p13, %p1498_p3  ;;  %p1211_p1 = scmp.lt.s32.totalorder %s1209_s5, %s1202_s8 }
  0x46   : > { %p1206_p5 = pneg %p1205_p12  ;;  %p1212_p2 = por %p1211_p1, %p1210_p6 }
  0x48   : > { %p1213_p7 = pnand %p1212_p2, %p1206_p5 }
  0x4a   : > { %1216 = shalt.err (!%p1213_p7)
}
  0x4b   : > { %1036 = dma.hbm_to_vmem [thread:$0]  (!%p1478_p0), %s237_s16, 32, %s240_s25, %s226_s20  }
  0x4c   : > { %s279_s9 = scalar_lea.hbm %s1788_s2, %s1483_s13  ;;  %s271_s17 = scalar_lea.vmem [#allocation7], %s1474_s11 }
  0x4d   : > { %s281_s26 = sshll.u32 %s271_s17, 4  ;;  %s1366_s5 = smov [#allocation7]   ;;  %s282_s26 = int_to_ptr.vmem [resolvable:$true] %s281_s26 }
  0x4e   : > { %s1230_s23 = scalar_lea.vmem %s282_s26, 128  ;;  %s1235_s18 = sshll.u32 %s1366_s5, 4  ;;  %s1236_s18 = int_to_ptr.vmem [resolvable:$false] %s1235_s18 }
  0x4f   : > { %p1231_p10 = scmp.ne.s32.totalorder %s282_s26, %s1230_s23  ;;  %s1237_s10 = scalar_lea.vmem %s1236_s18, 256 }
  0x50   : > { %p1238_p5 = scmp.lt.s32.totalorder %s282_s26, %s1236_s18  ;;  %p1239_p6 = scmp.lt.s32.totalorder %s1237_s10, %s1230_s23 }
  0x51   : > { %p1233_p13 = pnand %p1231_p10, %p1498_p3 }
  0x52   : > { %p1240_p1 = por %p1239_p6, %p1238_p5 }
  0x53   : > { %p1234_p12 = pneg %p1233_p13 }
  0x55   : > { %p1241_p2 = pnand %p1240_p1, %p1234_p12 }
  0x57   : > { %1244 = shalt.err (!%p1241_p2)
}
  0x58   : > { %1042 = dma.hbm_to_vmem [thread:$0]  (!%p1478_p0), %s279_s9, 128, %s282_s26, %s1494_s27  }
  0x59   : > { %s321_s16 = scalar_lea.hbm %s1790_s4, %s1483_s13  ;;  %s313_s25 = scalar_lea.vmem [#allocation10], %s1474_s11 }
  0x5a   : > { %s323_s20 = sshll.u32 %s313_s25, 4  ;;  %s1367_s1 = smov [#allocation10]   ;;  %s324_s20 = int_to_ptr.vmem [resolvable:$true] %s323_s20 }
  0x5b   : > { %s1258_s8 = scalar_lea.vmem %s324_s20, 128  ;;  %s1263_s3 = sshll.u32 %s1367_s1, 4  ;;  %s1264_s3 = int_to_ptr.vmem [resolvable:$false] %s1263_s3 }
  0x5c   : > { %p1259_p7 = scmp.ne.s32.totalorder %s324_s20, %s1258_s8  ;;  %s1265_s17 = scalar_lea.vmem %s1264_s3, 256 }
  0x5d   : > { %p1266_p12 = scmp.lt.s32.totalorder %s324_s20, %s1264_s3  ;;  %p1267_p5 = scmp.lt.s32.totalorder %s1265_s17, %s1258_s8 }
  0x5e   : > { %p1261_p10 = pnand %p1259_p7, %p1498_p3 }
  0x5f   : > { %p1268_p6 = por %p1267_p5, %p1266_p12 }
  0x60   : > { %p1262_p13 = pneg %p1261_p10 }
  0x62   : > { %p1269_p1 = pnand %p1268_p6, %p1262_p13 }
  0x64   : > { %1272 = shalt.err (!%p1269_p1)
}
  0x65   : > { %1048 = dma.hbm_to_vmem [thread:$0]  (!%p1478_p0), %s321_s16, 128, %s324_s20, %s1522_s7  }
  0x66   : > { %332 = sbr.rel (%p1511_p4) target bundleno = 433 (0x1b1), region = 40  ;;  %s1562_s11 = sand.u32 (!%p1511_p4), 1, %s1345_s19  }
  0x67   : > { %s1001_s13 = sshll.u32 (!%p1511_p4), %s1562_s11, 1  ;;  %s335_s27 = scalar_lea.sflag (!%p1511_p4), [#allocation3], %s1562_s11 }
  0x68   : > { %s1568_s28 = scalar_lea.vmem (!%p1511_p4), [#allocation2], %s1001_s13 }
  0x6b   : > { %1324 = dma.done.wait (%p1452_p8), %s335_s27, 32  }
  0x6c   : > { %1326 = vsyncadd (%p1452_p8), %s335_s27, 4294967264  ;;  %s343_s7 = sand.u32 1, %s1432_s24   ;;  %s1576_s12 = sshll.u32 %s1562_s11, 3 }
  0x6d   : > { %s344_s14 = scalar_lea.sflag [#allocation6], %s343_s7  ;;  %s347_s9 = scalar_lea.vmem [#allocation5], %s1576_s12 }
  0x6e   : > { %1328 = dma.done.wait (%p1452_p8), %s344_s14, 256  }
  0x6f   : > { %1330 = vsyncadd (%p1452_p8), %s344_s14, 4294967040  ;;  %s356_s26 = scalar_lea.vmem [#allocation7], %s1576_s12  ;;  %s362_s23 = scalar_lea.sflag [#allocation9], %s343_s7 }
  0x70   : > { %s365_s5 = scalar_lea.vmem [#allocation8], %s1576_s12 }
  0x71   : > { %1332 = dma.done.wait (%p1452_p8), %s362_s23, 256  }
  0x72   : > { %1334 = vsyncadd (%p1452_p8), %s362_s23, 4294967040  ;;  %vm444_vm0 = vcmask 1043456   ;;  %v1589_v0 = vld [vmem:[%s347_s9] sm:$0xff]  ;;  %v1591_v1 = vld [vmem:[%s356_s26] sm:$0xff]  ;;  %s374_s24 = scalar_lea.vmem [#allocation10], %s1576_s12  ;;  %v428_v61 = vlaneseq  ;;  %vm743_vm4 = vcmask 1040384  }
  0x73   : > { %v1595_v2 = vcombine.high %v1589_v0, %v1589_v0  ;;  %v445_v3 = vsel %vm444_vm0, %v1589_v0, -inf  ;;  %v1601_v4 = vcombine.high %v1591_v1, %v1591_v1  ;;  %v513_v5 = vsel %vm444_vm0, %v1591_v1, -inf  ;;  %v1609_v22 = vld [vmem:[%s365_s5] sm:$0xff]  ;;  %v1633_v45 = vld [vmem:[%s374_s24] sm:$0xff]  ;;  %s1009_s30 = sshll.u32 %s1353_s21, 5  ;;  %s420_s10 = scalar_lea.vmem [#allocation11], %s1001_s13 }
  0x74   : > { %v446_v6 = vrot.slane %v445_v3, 4  ;;  %v514_v9 = vrot.slane %v513_v5, 4  ;;  %v1615_v29 = vcombine.high %v1609_v22, %v1609_v22  ;;  %v581_v33 = vsel %vm444_vm0, %v1609_v22, -inf  ;;  %s801_s29 = sshll.u32 %s420_s10, 4  ;;  %s1823_s20 = sld [smem:[#allocation24_spill]]  ;;  %s802_s29 = int_to_ptr.vmem [resolvable:$true] %s801_s29 }
  0x75   : > { %v452_v7 = vsel %vm444_vm0, %v1595_v2, -inf  ;;  %v520_v11 = vsel %vm444_vm0, %v1601_v4, -inf  ;;  %v582_v35 = vrot.slane %v581_v33, 4  ;;  %v1638_v50 = vcombine.high %v1633_v45, %v1633_v45  ;;  %s787_s3 = scalar_lea.sflag [#allocation4], %s1562_s11  ;;  %s1273_s17 = scalar_lea.vmem %s802_s29, 32 }
  0x76   : > { %v453_v8 = vrot.slane %v452_v7, 4  ;;  %v447_v10 = vmax.f32 %v445_v3, %v446_v6  ;;  %v515_v13 = vmax.f32 %v513_v5, %v514_v9  ;;  %v521_v15 = vrot.slane %v520_v11, 4  ;;  %p1274_p8 = scmp.ne.s32.totalorder %s802_s29, %s1273_s17  ;;  %s1370_s21 = smov [#allocation11]  }
  0x77   : > { %v588_v37 = vsel %vm444_vm0, %v1615_v29, -inf  ;;  %v583_v39 = vmax.f32 %v581_v33, %v582_v35  ;;  %v649_v53 = vsel %vm444_vm0, %v1633_v45, -inf  ;;  %v656_v57 = vsel %vm444_vm0, %v1638_v50, -inf  ;;  %s1277_s13 = sshll.u32 %s1370_s21, 4  ;;  %s1278_s13 = int_to_ptr.vmem [resolvable:$false] %s1277_s13 }
  0x78   : > { %v454_v12 = vmax.f32 %v452_v7, %v453_v8  ;;  %v448_v14 = vrot.slane %v447_v10, 2  ;;  %v516_v17 = vrot.slane %v515_v13, 2  ;;  %v522_v19 = vmax.f32 %v520_v11, %v521_v15  ;;  %p1275_p0 = pnand %p1274_p8, %p1456_p9  ;;  %s1279_s27 = scalar_lea.vmem %s1278_s13, 64 }
  0x79   : > { %v589_v40 = vrot.slane %v588_v37, 4  ;;  %v584_v43 = vrot.slane %v583_v39, 2  ;;  %v650_v54 = vrot.slane %v649_v53, 4  ;;  %v657_v59 = vrot.slane %v656_v57, 4  ;;  %p1280_p4 = scmp.lt.s32.totalorder %s802_s29, %s1278_s13  ;;  %p1281_p2 = scmp.lt.s32.totalorder %s1279_s27, %s1273_s17 }
  0x7a   : > { %v455_v16 = vrot.slane %v454_v12, 2  ;;  %v449_v18 = vmax.f32 %v447_v10, %v448_v14  ;;  %v517_v21 = vmax.f32 %v515_v13, %v516_v17  ;;  %v523_v24 = vrot.slane %v522_v19, 2  ;;  %s1824_s8 = smov %s1823_s20  ;;  %s1744_s1 = scalar_lea.hbm %s1823_s20, %s1009_s30 }
  0x7b   : > { %v590_v44 = vmax.f32 %v588_v37, %v589_v40  ;;  %v585_v47 = vmax.f32 %v583_v39, %v584_v43  ;;  %v651_v58 = vmax.f32 %v649_v53, %v650_v54  ;;  %v658_v63 = vmax.f32 %v656_v57, %v657_v59  ;;  %p1276_p3 = pneg %p1275_p0  ;;  %p1282_p7 = por %p1281_p2, %p1280_p4 }
  0x7c   : > { %v456_v20 = vmax.f32 %v454_v12, %v455_v16  ;;  %v450_v23 = vrot.slane %v449_v18, 1  ;;  %v518_v26 = vrot.slane %v517_v21, 1  ;;  %v524_v28 = vmax.f32 %v522_v19, %v523_v24 }
  0x7d   : > { %v591_v48 = vrot.slane %v590_v44, 2  ;;  %v586_v51 = vrot.slane %v585_v47, 1  ;;  %v652_v62 = vrot.slane %v651_v58, 2  ;;  %v659_v6 = vrot.slane %v658_v63, 2  ;;  %p1283_p10 = pnand %p1282_p7, %p1276_p3 }
  0x7e   : > { %v457_v25 = vrot.slane %v456_v20, 1  ;;  %v1611_v27 = vmax.f32 %v449_v18, %v450_v23  ;;  %v1619_v31 = vmax.f32 %v517_v21, %v518_v26  ;;  %v525_v32 = vrot.slane %v524_v28, 1  ;;  %v1662_v21 = vld [vmem:[%s1568_s28] sm:$0x3] }
  0x7f   : > { %v592_v52 = vmax.f32 %v590_v44, %v591_v48  ;;  %v1642_v55 = vmax.f32 %v585_v47, %v586_v51  ;;  %v653_v5 = vmax.f32 %v651_v58, %v652_v62  ;;  %v1651_v8 = vshrl.u32 %v428_v61, 7 }
  0x80   : > { %v1617_v30 = vmax.f32 %v456_v20, %v457_v25  ;;  %v1625_v36 = vmax.f32 %v524_v28, %v525_v32  ;;  %v660_v10 = vmax.f32 %v658_v63, %v659_v6  ;;  %vm427_vm3 = vcmp.ne.s32.totalorder %v1662_v21, 255 }
  0x81   : > { %v593_v56 = vrot.slane %v592_v52, 1  ;;  %v654_v9 = vrot.slane %v653_v5, 1  ;;  %v1657_v17 = vsub.s32 0, %v1651_v8  ;;  %v1665_v23 = vsub.s32 1, %v1651_v8 }
  0x82   : > { %v461_v34 = vcombine.low %v1611_v27, %v1617_v30  ;;  %v529_v41 = vcombine.low %v1619_v31, %v1625_v36  ;;  %v661_v13 = vrot.slane %v660_v10, 1  ;;  %vm781_vm5 = vcmp.eq.s32.totalorder %v1651_v8, 0 }
  0x83   : > { %v1646_v60 = vmax.f32 %v592_v52, %v593_v56  ;;  %v1654_v16 = vmax.f32 %v653_v5, %v654_v9  ;;  %v433_v35 = vrot.slane %v1662_v21, %v1657_v17  ;;  %v437_v40 = vrot.slane %v1662_v21, %v1665_v23 }
  0x84   : > { %v463_v38 = vsub.f32 %v1589_v0, %v461_v34  ;;  %v531_v46 = vsub.f32 %v1591_v1, %v529_v41  ;;  %v1659_v19 = vmax.f32 %v660_v10, %v661_v13 }
  0x85   : > { %v597_v3 = vcombine.low %v1642_v55, %v1646_v60  ;;  %vm1678_vm1 = vcmp.eq.s32.totalorder %v1651_v8, %v433_v35  ;;  %vm1683_vm2 = vcmp.eq.s32.totalorder %v1651_v8, %v437_v40 }
  0x86   : > { %v464_v42 = vmul.f32 1.442695, %v463_v38  ;;  %v532_v49 = vmul.f32 1.442695, %v531_v46  ;;  %v665_v34 = vcombine.low %v1654_v16, %v1659_v19  ;;  %v487_v57 = vsel %vm1678_vm1, %v1589_v0, 0.0 }
  0x87   : > { %v599_v7 = vsub.f32 %v1609_v22, %v597_v3  ;;  %v555_v59 = vsel %vm1678_vm1, %v1591_v1, 0.0  ;;  %v488_v63 = vsel %vm1683_vm2, %v1595_v2, 0.0  ;;  %v489_v9 = vsel %vm444_vm0, %v487_v57, 0.0 }
  0x88   : > { %1109 = vpow2.f32 %v464_v42  ;;  %v667_v43 = vsub.f32 %v1633_v45, %v665_v34  ;;  %v557_v0 = vsel %vm444_vm0, %v555_v59, 0.0  ;;  %v556_v1 = vsel %vm1683_vm2, %v1601_v4, 0.0 }
  0x89   : > { %1111 = vpow2.f32 %v532_v49  ;;  %v600_v11 = vmul.f32 1.442695, %v599_v7 }
  0x8a   : > { %v668_v48 = vmul.f32 1.442695, %v667_v43 }
  0x8b   : > { %1113 = vpow2.f32 %v600_v11  ;;  %v496_v11 = vsel %vm444_vm0, %v488_v63, 0.0 }
  0x8c   : > { %1115 = vpow2.f32 %v668_v48  ;;  %v497_v34 = vrot.slane %v496_v11, 4 }
  0x95   : > { %v1110_v12 = vpop.eup %1109 }
  0x96   : > { %v467_v14 = vcombine.high %v1110_v12, %v1110_v12  ;;  %v469_v15 = vsel %vm444_vm0, %v1110_v12, 0.0  ;;  %v1112_v20 = vpop.eup %1111 }
  0x97   : > { %v470_v18 = vrot.slane %v469_v15, 4  ;;  %v535_v28 = vcombine.high %v1112_v20, %v1112_v20  ;;  %v537_v32 = vsel %vm444_vm0, %v1112_v20, 0.0  ;;  %v490_v20 = vrot.slane %v489_v9, 4 }
  0x98   : > { %v476_v24 = vsel %vm444_vm0, %v467_v14, 0.0  ;;  %v538_v33 = vrot.slane %v537_v32, 4  ;;  %v1114_v61 = vpop.eup %1113 }
  0x99   : > { %v471_v25 = vadd.f32 %v470_v18, %v469_v15  ;;  %v477_v26 = vrot.slane %v476_v24, 4  ;;  %v544_v39 = vsel %vm444_vm0, %v535_v28, 0.0  ;;  %v603_v5 = vcombine.high %v1114_v61, %v1114_v61 }
  0x9a   : > { %v539_v41 = vadd.f32 %v538_v33, %v537_v32  ;;  %v545_v42 = vrot.slane %v544_v39, 4  ;;  %v605_v6 = vsel %vm444_vm0, %v1114_v61, 0.0  ;;  %v623_v18 = vsel %vm1678_vm1, %v1609_v22, 0.0 }
  0x9b   : > { %v472_v37 = vrot.slane %v471_v25, 2  ;;  %v478_v38 = vadd.f32 %v477_v26, %v476_v24  ;;  %v606_v10 = vrot.slane %v605_v6, 4  ;;  %v612_v13 = vsel %vm444_vm0, %v603_v5, 0.0 }
  0x9c   : > { %v540_v46 = vrot.slane %v539_v41, 2  ;;  %v546_v47 = vadd.f32 %v545_v42, %v544_v39  ;;  %v613_v15 = vrot.slane %v612_v13, 4  ;;  %v564_v28 = vsel %vm444_vm0, %v556_v1, 0.0  ;;  %v1116_v42 = vpop.eup %1115 }
  0x9d   : > { %v479_v44 = vrot.slane %v478_v38, 2  ;;  %v473_v51 = vadd.f32 %v472_v37, %v471_v25  ;;  %v607_v14 = vadd.f32 %v606_v10, %v605_v6  ;;  %v558_v25 = vrot.slane %v557_v0, 4 }
  0x9e   : > { %v541_v53 = vadd.f32 %v540_v46, %v539_v41  ;;  %v547_v54 = vrot.slane %v546_v47, 2  ;;  %v614_v33 = vadd.f32 %v613_v15, %v612_v13  ;;  %v625_v4 = vsel %vm444_vm0, %v623_v18, 0.0 }
  0x9f   : > { %v480_v56 = vadd.f32 %v479_v44, %v478_v38  ;;  %v474_v62 = vrot.slane %v473_v51, 1  ;;  %v608_v32 = vrot.slane %v607_v14, 2  ;;  %v624_v39 = vsel %vm1683_vm2, %v1615_v29, 0.0 }
  0xa0   : > { %v548_v58 = vadd.f32 %v547_v54, %v546_v47  ;;  %v542_v3 = vrot.slane %v541_v53, 1  ;;  %v615_v38 = vrot.slane %v614_v33, 2  ;;  %v491_v22 = vadd.f32 %v490_v20, %v489_v9 }
  0xa1   : > { %v481_v7 = vrot.slane %v480_v56, 1  ;;  %v475_v2 = vadd.f32 %v474_v62, %v473_v51  ;;  %v609_v37 = vadd.f32 %v608_v32, %v607_v14  ;;  %v559_v40 = vadd.f32 %v558_v25, %v557_v0 }
  0xa2   : > { %v549_v12 = vrot.slane %v548_v58, 1  ;;  %v543_v24 = vadd.f32 %v542_v3, %v541_v53  ;;  %v565_v41 = vrot.slane %v564_v28, 4  ;;  %v616_v44 = vadd.f32 %v615_v38, %v614_v33 }
  0xa3   : > { %v482_v26 = vadd.f32 %v481_v7, %v480_v56  ;;  %1117 = vlog2.f32 %v475_v2  ;;  %v610_v43 = vrot.slane %v609_v37, 1  ;;  %v626_v46 = vrot.slane %v625_v4, 4 }
  0xa4   : > { %v550_v35 = vadd.f32 %v549_v12, %v548_v58  ;;  %1119 = vlog2.f32 %v543_v24  ;;  %v632_v47 = vsel %vm444_vm0, %v624_v39, 0.0  ;;  %v671_v48 = vcombine.high %v1116_v42, %v1116_v42 }
  0xa5   : > { %1121 = vlog2.f32 %v482_v26  ;;  %v673_v51 = vsel %vm444_vm0, %v1116_v42, 0.0  ;;  %v611_v53 = vadd.f32 %v610_v43, %v609_v37  ;;  %v617_v54 = vrot.slane %v616_v44, 1 }
  0xa6   : > { %1123 = vlog2.f32 %v550_v35  ;;  %v674_v56 = vrot.slane %v673_v51, 4  ;;  %v691_v29 = vsel %vm1678_vm1, %v1633_v45, 0.0  ;;  %v492_v57 = vrot.slane %v491_v22, 2 }
  0xa7   : > { %v498_v58 = vadd.f32 %v497_v34, %v496_v11  ;;  %v680_v59 = vsel %vm444_vm0, %v671_v48, 0.0  ;;  %v566_v61 = vadd.f32 %v565_v41, %v564_v28  ;;  %v618_v62 = vadd.f32 %v617_v54, %v616_v44 }
  0xa8   : > { %1125 = vlog2.f32 %v611_v53  ;;  %v675_v63 = vadd.f32 %v674_v56, %v673_v51  ;;  %v633_v3 = vrot.slane %v632_v47, 4  ;;  %v681_v5 = vrot.slane %v680_v59, 4 }
  0xa9   : > { %v692_v6 = vsel %vm1683_vm2, %v1638_v50, 0.0  ;;  %v693_v7 = vsel %vm444_vm0, %v691_v29, 0.0  ;;  %v560_v9 = vrot.slane %v559_v40, 2  ;;  %1127 = vlog2.f32 %v618_v62 }
  0xaa   : > { %v627_v49 = vadd.f32 %v626_v46, %v625_v4  ;;  %v676_v45 = vrot.slane %v675_v63, 2  ;;  %v499_v0 = vrot.slane %v498_v58, 2  ;;  %v682_v10 = vadd.f32 %v681_v5, %v680_v59 }
  0xab   : > { %v567_v11 = vrot.slane %v566_v61, 2  ;;  %v694_v1 = vrot.slane %v693_v7, 4  ;;  %v700_v13 = vsel %vm444_vm0, %v692_v6, 0.0  ;;  %v634_v2 = vadd.f32 %v633_v3, %v632_v47 }
  0xac   : > { %v677_v12 = vadd.f32 %v676_v45, %v675_v63  ;;  %v683_v14 = vrot.slane %v682_v10, 2  ;;  %v493_v15 = vadd.f32 %v492_v57, %v491_v22  ;;  %v561_v18 = vadd.f32 %v560_v9, %v559_v40 }
  0xad   : > { %v628_v20 = vrot.slane %v627_v49, 2  ;;  %v701_v25 = vrot.slane %v700_v13, 4  ;;  %v500_v28 = vadd.f32 %v499_v0, %v498_v58  ;;  %v568_v32 = vadd.f32 %v567_v11, %v566_v61 }
  0xae   : > { %v678_v52 = vrot.slane %v677_v12, 1  ;;  %v684_v24 = vadd.f32 %v683_v14, %v682_v10  ;;  %v695_v34 = vadd.f32 %v694_v1, %v693_v7  ;;  %v635_v4 = vrot.slane %v634_v2, 2 }
  0xaf   : > { %v494_v39 = vrot.slane %v493_v15, 1  ;;  %v562_v41 = vrot.slane %v561_v18, 1  ;;  %v629_v42 = vadd.f32 %v628_v20, %v627_v49  ;;  %v702_v44 = vadd.f32 %v701_v25, %v700_v13 }
  0xb0   : > { %v1118_v50 = vpop.eup %1117  ;;  %v679_v33 = vadd.f32 %v678_v52, %v677_v12  ;;  %v685_v37 = vrot.slane %v684_v24, 1  ;;  %v501_v46 = vrot.slane %v500_v28, 1  ;;  %v569_v47 = vrot.slane %v568_v32, 1 }
  0xb1   : > { %v1120_v26 = vpop.eup %1119  ;;  %v484_v22 = vmul.f32 0.6931472, %v1118_v50  ;;  %v696_v48 = vrot.slane %v695_v34, 2  ;;  %v636_v56 = vadd.f32 %v635_v4, %v634_v2  ;;  %v495_v29 = vadd.f32 %v494_v39, %v493_v15 }
  0xb2   : > { %v1122_v35 = vpop.eup %1121  ;;  %1129 = vlog2.f32 %v679_v33  ;;  %v552_v40 = vmul.f32 0.6931472, %v1120_v26  ;;  %v686_v43 = vadd.f32 %v685_v37, %v684_v24  ;;  %v563_v57 = vadd.f32 %v562_v41, %v561_v18 }
  0xb3   : > { %v1124_v38 = vpop.eup %1123  ;;  %v486_v53 = vmul.f32 0.6931472, %v1122_v35  ;;  %v630_v58 = vrot.slane %v629_v42, 1  ;;  %v503_v61 = vadd.f32 %v484_v22, %v1611_v27  ;;  %v703_v3 = vrot.slane %v702_v44, 2 }
  0xb4   : > { %v554_v54 = vmul.f32 0.6931472, %v1124_v38  ;;  %1131 = vlog2.f32 %v686_v43  ;;  %v571_v62 = vadd.f32 %v552_v40, %v1619_v31  ;;  %v502_v5 = vadd.f32 %v501_v46, %v500_v28 }
  0xb5   : > { %v1126_v51 = vpop.eup %1125  ;;  %v570_v6 = vadd.f32 %v569_v47, %v568_v32  ;;  %v697_v7 = vadd.f32 %v696_v48, %v695_v34  ;;  %v504_v9 = vadd.f32 %v486_v53, %v1617_v30  ;;  %v637_v0 = vrot.slane %v636_v56, 1 }
  0xb6   : > { %v1128_v59 = vpop.eup %1127  ;;  %v620_v63 = vmul.f32 0.6931472, %v1126_v51  ;;  %v572_v49 = vadd.f32 %v554_v54, %v1625_v36  ;;  %v631_v10 = vadd.f32 %v630_v58, %v629_v42  ;;  %v505_v11 = vsub.f32 %v503_v61, %v495_v29 }
  0xb7   : > { %v622_v45 = vmul.f32 0.6931472, %v1128_v59  ;;  %v573_v12 = vsub.f32 %v571_v62, %v563_v57  ;;  %v704_v13 = vadd.f32 %v703_v3, %v702_v44  ;;  %v698_v27 = vrot.slane %v697_v7, 1 }
  0xb8   : > { %v639_v1 = vadd.f32 %v620_v63, %v1642_v55  ;;  %v506_v2 = vsub.f32 %v504_v9, %v502_v5  ;;  %v574_v31 = vsub.f32 %v572_v49, %v570_v6  ;;  %v638_v14 = vadd.f32 %v637_v0, %v636_v56 }
  0xb9   : > { %v640_v15 = vadd.f32 %v622_v45, %v1646_v60  ;;  %v575_v20 = vadd.f32 %v573_v12, %v505_v11  ;;  %v705_v30 = vrot.slane %v704_v13, 1  ;;  %v699_v36 = vadd.f32 %v698_v27, %v697_v7 }
  0xba   : > { %v641_v52 = vsub.f32 %v639_v1, %v631_v10  ;;  %v576_v24 = vadd.f32 %v574_v31, %v506_v2  ;;  %v1368_v26 = vmov 1966171168   ;;  %v1369_v44 = vmov 0.0  }
  0xbb   : > { %v642_v25 = vsub.f32 %v640_v15, %v638_v14  ;;  %v717_v28 = vunpack.c.l.s4 %v1368_v26  ;;  %v706_v35 = vadd.f32 %v705_v30, %v704_v13  ;;  %v1007_v46 = vsel %vm427_vm3, 1.0, %v1369_v44 }
  0xbc   : > { %v643_v33 = vadd.f32 %v641_v52, %v575_v20  ;;  %v762_v47 = vrot.slane %v1007_v46, %v1657_v17  ;;  %v766_v48 = vrot.slane %v1007_v46, %v1665_v23 }
  0xbd   : > { %v644_v37 = vadd.f32 %v642_v25, %v576_v24  ;;  %v718_v38 = vunpack.c.0.s8 %v717_v28 }
  0xbe   : > { %v769_v29 = vsel %vm743_vm4, %v762_v47, 0.0  ;;  %v770_v57 = vsel %vm743_vm4, %v766_v48, 0.0 }
  0xbf   : > { %v1130_v18 = vpop.eup %1129  ;;  %v721_v22 = vsub.s32 %v718_v38, %v1651_v8  ;;  %v771_v21 = vadd.f32 %v770_v57, %v769_v29 }
  0xc0   : > { %v688_v50 = vmul.f32 0.6931472, %v1130_v18 }
  0xc1   : > { %v1132_v32 = vpop.eup %1131 }
  0xc2   : > { %v707_v55 = vadd.f32 %v688_v50, %v1654_v16  ;;  %v690_v34 = vmul.f32 0.6931472, %v1132_v32 }
  0xc4   : > { %v709_v4 = vsub.f32 %v707_v55, %v699_v36  ;;  %v708_v60 = vadd.f32 %v690_v34, %v1659_v19 }
  0xc6   : > { %v710_v39 = vsub.f32 %v708_v60, %v706_v35  ;;  %v711_v41 = vadd.f32 %v709_v4, %v643_v33 }
  0xc8   : > { %v712_v42 = vadd.f32 %v710_v39, %v644_v37 }
  0xca   : > { %v715_v40 = vcombine.low %v711_v41, %v712_v42 }
  0xcc   : > { %v722_v43 = vrot.slane %v715_v40, %v721_v22 }
  0xce   : > { %v729_v16 = vrot.slane %v722_v43, %v721_v22 }
  0xd0   : > { %v731_v51 = vsel %vm427_vm3, %v729_v16, 0.0 }
  0xd1   : > { %v736_v19 = vrot.slane %v731_v51, %v1657_v17  ;;  %v740_v53 = vrot.slane %v731_v51, %v1665_v23 }
  0xd3   : > { %v744_v54 = vsel %vm743_vm4, %v736_v19, 0.0  ;;  %v745_v56 = vsel %vm743_vm4, %v740_v53, 0.0 }
  0xd4   : > { %v746_v58 = vadd.f32 %v745_v56, %v744_v54 }
  0xd6   : > { %747 = vadd.xlane.f32.xlu0 %v746_v58 }
  0xda   : > { %772 = vadd.xlane.f32.xlu0 %v771_v21 }
 0x15f   : > { %v748_v59 = vpop.xlane.xlu0 %747 }
 0x160   : > { %v749_v61 = vrot.slane %v748_v59, 4 }
 0x162   : > { %v750_v62 = vadd.f32 %v749_v61, %v748_v59 }
 0x163   : > { %v773_v63 = vpop.xlane.xlu0 %772 }
 0x164   : > { %v751_v3 = vrot.slane %v750_v62, 2  ;;  %v774_v5 = vrot.slane %v773_v63, 4 }
 0x166   : > { %v775_v6 = vadd.f32 %v774_v5, %v773_v63  ;;  %v752_v17 = vadd.f32 %v751_v3, %v750_v62 }
 0x168   : > { %v776_v7 = vrot.slane %v775_v6, 2  ;;  %v753_v23 = vrot.slane %v752_v17, 1 }
 0x16a   : > { %v777_v9 = vadd.f32 %v776_v7, %v775_v6  ;;  %v754_v49 = vadd.f32 %v753_v23, %v752_v17 }
 0x16c   : > { %1017 = vpush %v754_v49  ;;  %v778_v45 = vrot.slane %v777_v9, 1 }
 0x16e   : > { %v779_v0 = vadd.f32 %v778_v45, %v777_v9 }
 0x170   : > { %1019 = vpush %v779_v0 }
 0x19d   : > { %s1018_s18 = spop %1017 }
 0x19e   : > { %v782_v10 = vstv %s1018_s18 }
 0x1a1   : > { %s1020_s15 = spop %1019 }
 0x1a2   : > { %v783_v11 = vstv %s1020_s15 }
 0x1a3   : > { %v784_v12 = vsel %vm781_vm5, %v782_v10, %v783_v11 }
 0x1a4   : > { %785 = vst [vmem:[%s420_s10] sm:$0x3] %v784_v12 }
 0x1a5   : > { %1286 = shalt.err (!%p1283_p10)
}
 0x1a6   : > { %s1287_s28 = scalar_lea.hbm %s1744_s1, 32  ;;  %s1291_s12 = scalar_lea.hbm %s1824_s8, 64 }
 0x1a7   : > { %p1288_p13 = scmp.ne.s32.totalorder %s1744_s1, %s1287_s28  ;;  %p1292_p6 = scmp.lt.s32.totalorder %s1744_s1, %s1824_s8 }
 0x1a8   : > { %p1293_p1 = scmp.lt.s32.totalorder %s1291_s12, %s1287_s28 }
 0x1a9   : > { %p1289_p12 = pnand %p1288_p13, %p1456_p9 }
 0x1aa   : > { %p1294_p8 = por %p1293_p1, %p1292_p6 }
 0x1ab   : > { %p1290_p5 = pneg %p1289_p12 }
 0x1ad   : > { %p1295_p0 = pnand %p1294_p8, %p1290_p5 }
 0x1af   : > { %1298 = shalt.err (!%p1295_p0)
}
 0x1b0   : > { %1031 = dma.vmem_to_hbm [thread:$0]  (%p1456_p9), %s802_s29, 32, %s1744_s1, %s787_s3  }
 0x1b1 PF: > { %s1825_s26 = sld [smem:[#allocation16_spill]] }
 0x1b2   : > { %s1827_s5 = sld [smem:[#allocation18_spill]] }
 0x1b7   : > { %s813_s24 = sand.u32 1, %s1825_s26  }
 0x1b8   : > { %p1828_p3 = scmp.ge.s32.totalorder %s1827_s5, 2  ;;  %s814_s30 = scalar_lea.sflag [#allocation4], %s813_s24 }
 0x1ba   : > { %p1050_p4 = pnand %p1828_p3, %p1463_p11 }
 0x1bc   : > { %p1051_p2 = pneg %p1050_p4 }
 0x1be   : > { %1336 = dma.done.wait (%p1051_p2), %s814_s30, 32  }
 0x1bf   : > { %1338 = vsyncadd (%p1051_p2), %s814_s30, 4294967264  ;;  %s27_s23 = sadd.s32 1, %s1827_s5   ;;  %s1829_s10 = sld [smem:[#allocation17_spill]] }
 0x1c0   : > { %p24_p7 = scmp.ge.s32.totalorder %s27_s23, 4   ;;  %s1830_s20 = sld [smem:[#allocation20_spill]] }
 0x1c1   : > { %s1831_s6 = sld [smem:[#allocation19_spill]]  ;;  %s1832_s18 = smov %s1345_s19 }
 0x1c2   : > { %s1834_s21 = smov %s1357_s22 }
 0x1c3   :  { %26 = sbr.rel (!%p24_p7) target bundleno = 14 (0xe), region = 133 }
 0x1c5   : > { %s1833_s19 = smov %s1829_s10 }
 0x1c7   : > { %s1835_s22 = smov %s1831_s6 }
 0x1c8   :  { %819 = vsyncpa [#allocation3], 1 }
 0x1c9   :  { %821 = vsyncpa [#allocation3 + $0x1], 1 }
 0x1ca   :  { %822 = vsyncpa [#allocation6], 1 }
 0x1cb   :  { %824 = vsyncpa [#allocation6 + $0x1], 1 }
 0x1cc   :  { %825 = vsyncpa [#allocation9], 1 }
 0x1cd   :  { %827 = vsyncpa [#allocation9 + $0x1], 1 }
 0x1ce   :  { %828 = vsyncpa [#allocation4], 1 }
 0x1cf   :  { %830 = vsyncpa [#allocation4 + $0x1], 1 }

</bundles_post_ra>
